<compile_context>
chip_gen: v7x
topology: tpu7x:2x2x1
jax: 0.10.0
libtpu: 0.0.40
codegen_flags: <defaults>
</compile_context>

<pallas_src>
import jax
import jax.numpy as jnp
from jax.experimental import pallas as pl
from jax.experimental.pallas import tpu as pltpu


def joint_att_kernel(x_ref, w1_ref, b1_ref, w2_ref, b2_ref, o_ref):
    # x_ref : (bn, CT//G, G*V)   lane-dense slab for one batch block
    # w1_ref: (G*V, H)           w1 * bn_scale / (C*T), tiled G times (group fold)
    # b1_ref: (1, H)             b1 with BN scale/shift folded in
    # w2_ref: (H, V), b2_ref: (1, V)
    # o_ref : (bn, V)
    x = x_ref[...]

    # Pooling: sum over the (C*T)//G sublane axis; the remaining sum over the
    # G lane-groups (and the 1/(C*T) mean divisor) is folded into w1_ref.
    partial = jnp.sum(x, axis=1)                                   # (bn, G*V)

    # Conv2d(V, H, 1) + BatchNorm (folded) — one batched matmul.
    h = jnp.dot(partial, w1_ref[...],
                preferred_element_type=jnp.float32) + b1_ref[...]  # (bn, H)
    h = jnp.maximum(h, 0.0)                                        # ReLU

    # Conv2d(H, V, 1)
    logits = jnp.dot(h, w2_ref[...],
                     preferred_element_type=jnp.float32) + b2_ref[...]  # (bn, V)

    # Softmax over the joint axis (EUP exp + EUP reciprocal).
    m = jnp.max(logits, axis=-1, keepdims=True)
    e = jnp.exp(logits - m)
    denom = jnp.sum(e, axis=-1, keepdims=True)
    o_ref[...] = e * pl.reciprocal(denom, approx=False)


def joint_att(x, w1, b1, bn_gamma, bn_beta, bn_mean, bn_var, w2, b2,
              eps=1e-5, block_n=None):
    """x: (N, C, T, V) -> (N, 1, 1, V) attention weights (inference-mode BN)."""
    N, C, T, V = x.shape
    H = w1.shape[1]
    CT = C * T

    # ---- Fold BatchNorm (inference) + pooling divisor into conv1 ----------
    s = bn_gamma / jnp.sqrt(bn_var + eps)                    # (H,)
    w1f = (w1 * s[None, :]) / CT                             # (V, H)
    b1f = (b1 * s + bn_beta - bn_mean * s).reshape(1, H)     # (1, H)
    b2r = b2.reshape(1, V)                                   # (1, V)

    # ---- Lane-dense layout: fold G chunks of C*T onto the lane axis --------
    # reshape (N, CT, V) -> (N, CT//G, G*V) is a free row-major regroup; the
    # sum over the G lane-groups is absorbed into w1 by tiling it G times.
    G = max(1, 128 // V)
    while G > 1 and CT % G:
        G //= 2
    w1g = jnp.tile(w1f, (G, 1))                              # (G*V, H)
    x2 = x.astype(jnp.float32).reshape(N, CT // G, G * V)

    # ---- Batch blocking ----------------------------------------------------
    # Single grid step for small/medium N; 256-row (8-aligned) blocks for
    # large N so a 'parallel' grid axis can feed both v7x TensorCores.
    if block_n is None:
        block_n = N if N <= 256 else 256
    n_blocks = -(-N // block_n)
    n_pad = n_blocks * block_n
    if n_pad != N:
        x2 = jnp.pad(x2, ((0, n_pad - N), (0, 0), (0, 0)))   # zero rows -> uniform softmax, sliced off below

    out = pl.pallas_call(
        joint_att_kernel,
        out_shape=jax.ShapeDtypeStruct((n_pad, V), jnp.float32),
        grid_spec=pltpu.PrefetchScalarGridSpec(
            num_scalar_prefetch=0,
            grid=(n_blocks,),
            in_specs=[
                pl.BlockSpec((block_n, CT // G, G * V), lambda i: (i, 0, 0)),  # x slab
                pl.BlockSpec((G * V, H), lambda i: (0, 0)),                    # W1 (folded, tiled)
                pl.BlockSpec((1, H), lambda i: (0, 0)),                        # b1 (folded)
                pl.BlockSpec((H, V), lambda i: (0, 0)),                        # W2
                pl.BlockSpec((1, V), lambda i: (0, 0)),                        # b2
            ],
            out_specs=pl.BlockSpec((block_n, V), lambda i: (i, 0)),
        ),
        compiler_params=pltpu.CompilerParams(
            dimension_semantics=("parallel",)),
    )(x2, w1g, b1f, w2, b2r)

    return out[:N].reshape(N, 1, 1, V)


def joint_att_ref(x, w1, b1, bn_gamma, bn_beta, bn_mean, bn_var, w2, b2, eps=1e-5):
    """Pure-JAX reference of the PyTorch forward (inference-mode BN)."""
    N, C, T, V = x.shape
    pooled = jnp.mean(x, axis=(1, 2))                 # (N, V)  == pool over (T, C)
    h = pooled @ w1 + b1                              # (N, H)
    h = (h - bn_mean) / jnp.sqrt(bn_var + eps) * bn_gamma + bn_beta
    h = jnp.maximum(h, 0.0)
    logits = h @ w2 + b2                              # (N, V)
    att = jax.nn.softmax(logits, axis=-1)
    return att.reshape(N, 1, 1, V)


if __name__ == "__main__":
    # parts -> num_joint = 16, hidden = num_joint // 2 = 8
    parts = [list(range(0, 4)), list(range(4, 10)), list(range(10, 16))]
    V = sum(len(p) for p in parts)     # 16
    H = V // 2                         # 8
    N, C, T = 2, 4, 8                  # input x: (N, C, T, V)

    key = jax.random.PRNGKey(0)
    kx, k1, k2, k3, k4, k5, k6, k7, k8 = jax.random.split(key, 9)

    x = jax.random.normal(kx, (N, C, T, V), dtype=jnp.float32)

    # Conv2d(V, H, 1) weight (H, V, 1, 1) stored in matmul convention (V, H);
    # same for Conv2d(H, V, 1) stored as (H, V).
    w1 = 0.3 * jax.random.normal(k1, (V, H), dtype=jnp.float32)
    b1 = 0.1 * jax.random.normal(k2, (H,), dtype=jnp.float32)
    w2 = 0.3 * jax.random.normal(k3, (H, V), dtype=jnp.float32)
    b2 = 0.1 * jax.random.normal(k4, (V,), dtype=jnp.float32)

    # BatchNorm2d(H) parameters / running stats (inference mode).
    bn_gamma = 1.0 + 0.1 * jax.random.normal(k5, (H,), dtype=jnp.float32)
    bn_beta = 0.1 * jax.random.normal(k6, (H,), dtype=jnp.float32)
    bn_mean = 0.05 * jax.random.normal(k7, (H,), dtype=jnp.float32)
    bn_var = jnp.abs(0.2 * jax.random.normal(k8, (H,), dtype=jnp.float32)) + 0.5

    out = joint_att(x, w1, b1, bn_gamma, bn_beta, bn_mean, bn_var, w2, b2)
    out = jax.block_until_ready(out)

    ref = joint_att_ref(x, w1, b1, bn_gamma, bn_beta, bn_mean, bn_var, w2, b2)
    assert out.shape == (N, 1, 1, V), out.shape
    assert jnp.allclose(out, ref, atol=1e-5, rtol=1e-5), "mismatch vs reference"
    assert jnp.allclose(jnp.sum(out, axis=-1), 1.0, atol=1e-5), "softmax not normalized"

    print("KERNEL_OK")
</pallas_src>

<mosaic_0001>
module attributes {stable_mosaic.version = 11 : i64} {
  func.func @joint_att_kernel(%arg0: i32, %arg1: memref<2x4x128xf32, #tpu.memory_space<vmem>>, %arg2: memref<128x8xf32, #tpu.memory_space<vmem>>, %arg3: memref<1x8xf32, #tpu.memory_space<vmem>>, %arg4: memref<8x16xf32, #tpu.memory_space<vmem>>, %arg5: memref<1x16xf32, #tpu.memory_space<vmem>>, %arg6: memref<2x16xf32, #tpu.memory_space<vmem>>) attributes {dimension_semantics = [#tpu.dimension_semantics<parallel>], iteration_bounds = array<i64: 1>, scalar_prefetch = 0 : i64, scratch_operands = 0 : i64, tpu.core_type = #tpu.core_type<tc>, window_params = [{transform_indices = @transform_0, window_bounds = array<i64: 2, 4, 128>}, {pipeline_mode = #tpu.pipeline_mode<synchronous>, transform_indices = @transform_1, window_bounds = array<i64: 128, 8>}, {pipeline_mode = #tpu.pipeline_mode<synchronous>, transform_indices = @transform_2, window_bounds = array<i64: 1, 8>}, {pipeline_mode = #tpu.pipeline_mode<synchronous>, transform_indices = @transform_3, window_bounds = array<i64: 8, 16>}, {pipeline_mode = #tpu.pipeline_mode<synchronous>, transform_indices = @transform_4, window_bounds = array<i64: 1, 16>}, {transform_indices = @transform_5, window_bounds = array<i64: 2, 16>}]} {
    %c0 = arith.constant 0 : index
    %c0_0 = arith.constant 0 : index
    %c0_1 = arith.constant 0 : index
    %0 = vector.load %arg1[%c0, %c0_0, %c0_1] : memref<2x4x128xf32, #tpu.memory_space<vmem>>, vector<2x4x128xf32>
    %cst = arith.constant dense<0.000000e+00> : vector<2x128xf32>
    %1 = vector.multi_reduction <add>, %0, %cst [1] : vector<2x4x128xf32> to vector<2x128xf32>
    %c0_2 = arith.constant 0 : index
    %c0_3 = arith.constant 0 : index
    %2 = vector.load %arg2[%c0_2, %c0_3] : memref<128x8xf32, #tpu.memory_space<vmem>>, vector<128x8xf32>
    %cst_4 = arith.constant dense<0.000000e+00> : vector<2x8xf32>
    %3 = tpu.matmul %1, %2, %cst_4 {dimension_numbers = #tpu.dot_dimension_numbers<[1], [0], [0], [1], [0, 0, 1, 1], [], []>} : vector<2x128xf32>, vector<128x8xf32>, vector<2x8xf32> -> vector<2x8xf32>
    %c0_5 = arith.constant 0 : index
    %c0_6 = arith.constant 0 : index
    %4 = vector.load %arg3[%c0_5, %c0_6] : memref<1x8xf32, #tpu.memory_space<vmem>>, vector<1x8xf32>
    %5 = vector.broadcast %4 : vector<1x8xf32> to vector<2x8xf32>
    %6 = arith.addf %3, %5 : vector<2x8xf32>
    %cst_7 = arith.constant 0.000000e+00 : f32
    %7 = vector.broadcast %cst_7 : f32 to vector<2x8xf32>
    %8 = arith.maximumf %6, %7 : vector<2x8xf32>
    %c0_8 = arith.constant 0 : index
    %c0_9 = arith.constant 0 : index
    %9 = vector.load %arg4[%c0_8, %c0_9] : memref<8x16xf32, #tpu.memory_space<vmem>>, vector<8x16xf32>
    %cst_10 = arith.constant dense<0.000000e+00> : vector<2x16xf32>
    %10 = tpu.matmul %8, %9, %cst_10 {dimension_numbers = #tpu.dot_dimension_numbers<[1], [0], [0], [1], [0, 0, 1, 1], [], []>} : vector<2x8xf32>, vector<8x16xf32>, vector<2x16xf32> -> vector<2x16xf32>
    %c0_11 = arith.constant 0 : index
    %c0_12 = arith.constant 0 : index
    %11 = vector.load %arg5[%c0_11, %c0_12] : memref<1x16xf32, #tpu.memory_space<vmem>>, vector<1x16xf32>
    %12 = vector.broadcast %11 : vector<1x16xf32> to vector<2x16xf32>
    %13 = arith.addf %10, %12 : vector<2x16xf32>
    %cst_13 = arith.constant dense<0xFF800000> : vector<2xf32>
    %14 = vector.multi_reduction <maximumf>, %13, %cst_13 [1] : vector<2x16xf32> to vector<2xf32>
    %15 = vector.shape_cast %14 : vector<2xf32> to vector<2x1xf32>
    %16 = vector.broadcast %15 : vector<2x1xf32> to vector<2x16xf32>
    %17 = arith.subf %13, %16 : vector<2x16xf32>
    %18 = math.exp %17 : vector<2x16xf32>
    %cst_14 = arith.constant dense<0.000000e+00> : vector<2xf32>
    %19 = vector.multi_reduction <add>, %18, %cst_14 [1] : vector<2x16xf32> to vector<2xf32>
    %20 = vector.shape_cast %19 : vector<2xf32> to vector<2x1xf32>
    %21 = tpu.reciprocal %20 : vector<2x1xf32> -> vector<2x1xf32>
    %22 = vector.broadcast %21 : vector<2x1xf32> to vector<2x16xf32>
    %23 = arith.mulf %18, %22 : vector<2x16xf32>
    %c0_15 = arith.constant 0 : index
    %c0_16 = arith.constant 0 : index
    %24 = vector.load %arg6[%c0_15, %c0_16] : memref<2x16xf32, #tpu.memory_space<vmem>>, vector<2x16xf32>
    tpu.vector_store %arg6[%c0_15, %c0_16], %23 {strides = array<i32>} : memref<2x16xf32, #tpu.memory_space<vmem>>, vector<2x16xf32>,
    return
  }
  func.func @transform_0(%arg0: i32) -> (i32, i32, i32) {
    %c0_i32 = arith.constant 0 : i32
    %c0_i32_0 = arith.constant 0 : i32
    %c0_i32_1 = arith.constant 0 : i32
    return %arg0, %c0_i32, %c0_i32_0 : i32, i32, i32
  }
  func.func @transform_1(%arg0: i32) -> (i32, i32) {
    %c0_i32 = arith.constant 0 : i32
    %c0_i32_0 = arith.constant 0 : i32
    %c0_i32_1 = arith.constant 0 : i32
    return %c0_i32, %c0_i32_0 : i32, i32
  }
  func.func @transform_2(%arg0: i32) -> (i32, i32) {
    %c0_i32 = arith.constant 0 : i32
    %c0_i32_0 = arith.constant 0 : i32
    %c0_i32_1 = arith.constant 0 : i32
    return %c0_i32, %c0_i32_0 : i32, i32
  }
  func.func @transform_3(%arg0: i32) -> (i32, i32) {
    %c0_i32 = arith.constant 0 : i32
    %c0_i32_0 = arith.constant 0 : i32
    %c0_i32_1 = arith.constant 0 : i32
    return %c0_i32, %c0_i32_0 : i32, i32
  }
  func.func @transform_4(%arg0: i32) -> (i32, i32) {
    %c0_i32 = arith.constant 0 : i32
    %c0_i32_0 = arith.constant 0 : i32
    %c0_i32_1 = arith.constant 0 : i32
    return %c0_i32, %c0_i32_0 : i32, i32
  }
  func.func @transform_5(%arg0: i32) -> (i32, i32) {
    %c0_i32 = arith.constant 0 : i32
    %c0_i32_0 = arith.constant 0 : i32
    return %arg0, %c0_i32 : i32, i32
  }
}

</mosaic_0001>

<bundles_post_ra>
// kernel: tpu_custom_call.1
= control target key start
LH: loop header
LB: loop body
LE: loop exit
PB: predicated region body
PF: predicated region fallthrough
CT: control target
= control target key end

     0   :  { %v364_v3 = vmov 0.0|0.0   ;;  %vm365_vm0 = vmmov 0   ;;  %v366_v6 = vmov 0.0   ;;  %vm23_vm1 = vcmask 1043456   ;;  %s476_s0 = inlined_call_operand.vmem [shape: f32[2,4,128], index: 0, kind: input, shape index: {}]   ;;  %s477_s1 = inlined_call_operand.vmem [shape: f32[128,8], index: 1, kind: input, shape index: {}]   ;;  %s478_s2 = inlined_call_operand.vmem [shape: f32[1,8], index: 2, kind: input, shape index: {}]   ;;  %s479_s3 = inlined_call_operand.vmem [shape: f32[8,16], index: 3, kind: input, shape index: {}]   ;;  %s480_s4 = inlined_call_operand.vmem [shape: f32[1,16], index: 4, kind: input, shape index: {}]   ;;  %s481_s5 = inlined_call_operand.hbm [shape: f32[2,16], index: 5, kind: output, shape index: {}]  }
   0x1   :  { %v38_v0 = vld [vmem:[%s477_s1] sm:$0xff]  ;;  %v39_v1 = vld [vmem:[%s477_s1 + $0x8] sm:$0xff]  ;;  %v40_v2 = vld [vmem:[%s477_s1 + $0x10] sm:$0xff]  ;;  %308 = vmatprep.subr.bf16.mxu0 %v364_v3  ;;  %300 = vmatprep.mubr.msk.f32.mxu0 %vm365_vm0, %v366_v6 }
   0x2   :  { %v309_v4 = vpack.c.bf16 %v39_v1, %v38_v0  ;;  %v41_v5 = vld [vmem:[%s477_s1 + $0x18] sm:$0xff]  ;;  %303 = vmatprep.subr.mxu1 %v366_v6  ;;  %305 = vmatprep.mubr.msk.f32.mxu1 %vm365_vm0, %v366_v6  ;;  %v42_v8 = vld [vmem:[%s477_s1 + $0x20] sm:$0xff]  ;;  %v43_v9 = vld [vmem:[%s477_s1 + $0x28] sm:$0xff] }
   0x3   :  { %v312_v7 = vpack.c.bf16 %v41_v5, %v40_v2  ;;  %v21_v10 = vld [vmem:[%s476_s0] sm:$0xf]  ;;  %v22_v11 = vld [vmem:[%s476_s0 + $0x4] sm:$0xf] }
   0x4   :  { %310 = vmatpush3.bf16.msra.mxu0 %v309_v4  ;;  %v24_v12 = vsel %vm23_vm1, %v21_v10, 0.0  ;;  %v31_v13 = vsel %vm23_vm1, %v22_v11, 0.0 }
   0x5   :  { %311 = vmatprep.subr.bf16.mxu0 %v364_v3 }
   0x6   :  { %10 = vsyncpa [#allocation3], 0  ;;  %v315_v14 = vpack.c.bf16 %v43_v9, %v42_v8  ;;  %v25_v15 = vrot.slane %v24_v12, 4  ;;  %v32_v16 = vrot.slane %v31_v13, 4  ;;  %v44_v17 = vld [vmem:[%s477_s1 + $0x30] sm:$0xff]  ;;  %v45_v18 = vld [vmem:[%s477_s1 + $0x38] sm:$0xff] }
   0x7   :  { %v318_v19 = vpack.c.bf16 %v45_v18, %v44_v17  ;;  %v46_v22 = vld [vmem:[%s477_s1 + $0x40] sm:$0xff]  ;;  %v47_v23 = vld [vmem:[%s477_s1 + $0x48] sm:$0xff]  ;;  %v48_v27 = vld [vmem:[%s477_s1 + $0x50] sm:$0xff]  ;;  %vm63_vm2 = vcmask 1041409   ;;  %vm145_vm3 = vcmask 64512   ;;  %vm219_vm4 = vcmask 123904  }
   0x8   :  { %313 = vmatpush3.bf16.msra.mxu0 %v312_v7  ;;  %v26_v20 = vadd.f32 %v25_v15, %v24_v12  ;;  %v33_v21 = vadd.f32 %v32_v16, %v31_v13  ;;  %v321_v24 = vpack.c.bf16 %v47_v23, %v46_v22  ;;  %v49_v28 = vld [vmem:[%s477_s1 + $0x58] sm:$0xff]  ;;  %v50_v32 = vld [vmem:[%s477_s1 + $0x60] sm:$0xff]  ;;  %v51_v33 = vld [vmem:[%s477_s1 + $0x68] sm:$0xff] }
   0x9   :  { %314 = vmatprep.subr.bf16.mxu0 %v364_v3  ;;  %v324_v29 = vpack.c.bf16 %v49_v28, %v48_v27  ;;  %v327_v34 = vpack.c.bf16 %v51_v33, %v50_v32  ;;  %v52_v37 = vld [vmem:[%s477_s1 + $0x70] sm:$0xff]  ;;  %v53_v38 = vld [vmem:[%s477_s1 + $0x78] sm:$0xff]  ;;  %v137_v43 = vld [vmem:[%s479_s3] sm:$0xff] }
   0xa   :  { %v27_v25 = vrot.slane %v26_v20, 2  ;;  %v34_v26 = vrot.slane %v33_v21, 2  ;;  %v330_v39 = vpack.c.bf16 %v53_v38, %v52_v37  ;;  %304 = vmatpush3.msra.mxu1 %v137_v43  ;;  %v246_v44 = vld [vmem:[%s478_s2] ss:$0 sm:$0xff]  ;;  %s367_s2 = smov [#allocation2]  }
   0xb   :  { %v247_v49 = vld [vmem:[%s480_s4] ss:$0 sm:$0xff]  ;;  %s238_s3 = sshll.u32 %s367_s2, 4  ;;  %s239_s3 = int_to_ptr.vmem [resolvable:$true] %s238_s3 }
   0xc   :  { %316 = vmatpush3.bf16.msra.mxu0 %v315_v14  ;;  %v28_v30 = vadd.f32 %v27_v25, %v26_v20  ;;  %v35_v31 = vadd.f32 %v34_v26, %v33_v21  ;;  %s340_s4 = scalar_lea.vmem %s239_s3, 32  ;;  %p345_p1 = scmp.lt.s32.totalorder %s239_s3, %s239_s3 }
   0xd   :  { %317 = vmatprep.subr.bf16.mxu0 %v364_v3  ;;  %p341_p0 = scmp.ne.s32.totalorder %s239_s3, %s340_s4  ;;  %p346_p2 = scmp.lt.s32.totalorder %s340_s4, %s340_s4 }
   0xe   :  { %v29_v35 = vrot.slane %v28_v30, 1  ;;  %v36_v36 = vrot.slane %v35_v31, 1 }
   0xf   :  { %p347_p3 = por %p346_p2, %p345_p1 }
  0x10   :  { %319 = vmatpush3.bf16.msra.mxu0 %v318_v19  ;;  %v30_v40 = vadd.f32 %v29_v35, %v28_v30  ;;  %v37_v41 = vadd.f32 %v36_v36, %v35_v31 }
  0x11   :  { %320 = vmatprep.subr.bf16.mxu0 %v364_v3  ;;  %p348_p4 = pnand %p347_p3, %p341_p0 }
  0x12   :  { %v64_v42 = vsel %vm63_vm2, %v37_v41, %v30_v40 }
  0x14   :  { %322 = vmatpush3.bf16.msra.mxu0 %v321_v24 }
  0x15   :  { %323 = vmatprep.subr.bf16.mxu0 %v364_v3 }
  0x18   :  { %325 = vmatpush3.bf16.msra.mxu0 %v324_v29 }
  0x19   :  { %326 = vmatprep.subr.bf16.mxu0 %v364_v3 }
  0x1c   :  { %328 = vmatpush3.bf16.msra.mxu0 %v327_v34 }
  0x1d   :  { %329 = vmatprep.subr.bf16.mxu0 %v364_v3 }
  0x20   :  { %331 = vmatpush3.bf16.msra.mxu0 %v330_v39 }
  0x23   :  { %301 = vmatmul.mubr.f32.vlgmr.msra.gmra.mrb[0].mxu0 %v64_v42 }
  0xf6   :  { %v132_v45 = vpop.f32.mrb[0].mxu0 }
  0xf7   :  { %v133_v46 = vadd.f32 %v246_v44, %v132_v45  ;;  %v302_v47 = vpop.f32.mrb[1].mxu0 }
  0xf9   :  { %v136_v48 = vmax.f32 %v133_v46, 0.0 }
  0xfb   :  { %306 = vmatmul.mubr.msk.f32.vlgmr.msra.gmra.mrb[0].mxu1 %vm145_vm3, %v136_v48 }
 0x1ce   :  { %v215_v50 = vpop.f32.mrb[0].mxu1 }
 0x1cf   :  { %v216_v51 = vadd.f32 %v247_v49, %v215_v50  ;;  %v307_v52 = vpop.f32.mrb[1].mxu1 }
 0x1d1   :  { %v220_v53 = vsel %vm219_vm4, %v216_v51, -inf }
 0x1d2   :  { %221 = vmax.xlane.f32.xlu0 %v220_v53 }
 0x25f   :  { %v222_v54 = vpop.xlane.xlu0 %221 }
 0x260   :  { %v223_v55 = vsub.f32 %v216_v51, %v222_v54 }
 0x262   :  { %v224_v56 = vmul.f32 1.442695, %v223_v55 }
 0x264   :  { %336 = vpow2.f32 %v224_v56 }
 0x26e   :  { %v337_v57 = vpop.eup %336 }
 0x26f   :  { %v226_v58 = vsel %vm219_vm4, %v337_v57, 0.0 }
 0x270   :  { %227 = vadd.xlane.f32.xlu0 %v226_v58 }
 0x2fd   :  { %v228_v59 = vpop.xlane.xlu0 %227 }
 0x2fe   :  { %338 = vrcp.f32 %v228_v59 }
 0x308   :  { %v339_v60 = vpop.eup %338 }
 0x309   :  { %v230_v61 = vmul.f32 %v339_v60, %v337_v57 }
 0x30b   :  { %231 = vst.msk [vmem:[#allocation2] sm:$0x3] %vm219_vm4, %v230_v61 }
 0x30c   :  { %351 = shalt.err (!%p348_p4)
}
 0x30d   :  { %s352_s10 = scalar_lea.hbm %s481_s5, 32 }
 0x30e   :  { %p353_p5 = scmp.ne.s32.totalorder %s481_s5, %s352_s10  ;;  %p356_p6 = scmp.lt.u32.totalorder %s352_s10, %s481_s5 }
 0x310   :  { %p358_p7 = pnand %p356_p6, %p353_p5 }
 0x312   :  { %361 = shalt.err (!%p358_p7)
}
 0x313   :  { %241 = dma.vmem_to_hbm [thread:$0]  %s239_s3, 32, %s481_s5, [#allocation3]  }
 0x314   :  { %362 = dma.done.wait [#allocation3], 32  }
 0x315   :  { %363 = vsyncadd [#allocation3], 4294967264 }
 0x316   :  { %245 = vsyncpa [#allocation3], 1 }

</bundles_post_ra>
